<compile_context>
chip_gen: v5e
topology: v5e:2x2
jax: 0.10.0
libtpu: 0.0.40
codegen_flags: <defaults>
</compile_context>

<pallas_src>
import jax
import jax.numpy as jnp
from jax.experimental import pallas as pl
from jax.experimental.pallas import tpu as pltpu


def _fused_kernel(agg_ref, vis_ref, loc_ref,
                  we1_ref, be1_ref,
                  w_agg_ref, b_agg_ref,
                  wl1_loc_ref, bl1_ref,
                  wl2_ref, bl2_ref,
                  out_ref):
    TB, N, F_in = agg_ref.shape

    # ---- Embed layer 1: one clean 2D MXU matmul over all (batch, neighbor) rows ----
    x2d = agg_ref[...].reshape(TB * N, F_in)                          # (TB*N, F_in)
    h = jnp.tanh(
        jnp.dot(x2d, we1_ref[...], preferred_element_type=jnp.float32)
        + be1_ref[...])                                               # (TB*N, H_e)

    # ---- Sum over 'neighbor' BEFORE the (linear) second embed layer ----
    hsum = jnp.sum(h.reshape(TB, N, -1), axis=1)                      # (TB, H_e)

    # Mean-mode normalization: reciprocal on the EUP slot (no guard: matches reference).
    inv_vis = pl.reciprocal(vis_ref[...], approx=True)                # (TB, 1)

    # ---- Pre-fused Linear2 -> mean -> wl1_agg path ----
    # w_agg = we2 @ wl1_agg ; b_agg = N * (be2 @ wl1_agg)  (prepared in the wrapper)
    agg_contrib = (jnp.dot(hsum, w_agg_ref[...],
                           preferred_element_type=jnp.float32)
                   + b_agg_ref[...]) * inv_vis                        # (TB, H_l)

    # ---- later_layer MLP on concat(local, agg), concat split into two matmuls ----
    z = (jnp.dot(loc_ref[...], wl1_loc_ref[...],
                 preferred_element_type=jnp.float32)
         + agg_contrib + bl1_ref[...])
    hl = jnp.tanh(z)
    out = jnp.dot(hl, wl2_ref[...], preferred_element_type=jnp.float32) + bl2_ref[...]
    out_ref[...] = out.astype(out_ref.dtype)


def full_aggregating_embedder(agg_obs, visible_count, local_obs, params, *, tb=None):
    """agg_obs: (B, N, F_in); visible_count: (B, 1); local_obs: (B, L)."""
    B, N, F_in = agg_obs.shape
    L = local_obs.shape[1]
    we1, be1, we2, be2, wl1_loc, wl1_agg, bl1, wl2, bl2 = params
    latent_dim = wl2.shape[1]

    # ---- offline algebraic fusion (Mean mode is linear past tanh) ----
    #   (sum_n(h_n @ we2 + be2) / vis) @ wl1_agg
    #     == (hsum @ (we2 @ wl1_agg) + N * (be2 @ wl1_agg)) / vis
    w_agg = jnp.dot(we2, wl1_agg, preferred_element_type=jnp.float32)           # (H_e, H_l)
    b_agg = float(N) * jnp.dot(be2, wl1_agg, preferred_element_type=jnp.float32)  # (1, H_l)

    # ---- batch tiling: full batch when small; multiples of 8 otherwise ----
    if tb is None:
        tb = B if B <= 256 else 256
    if B % tb != 0 or (tb != B and tb % 8 != 0):
        tb = B
    n_tiles = B // tb

    act_specs = [
        pl.BlockSpec((tb, N, F_in), lambda i: (i, 0, 0)),
        pl.BlockSpec((tb, 1), lambda i: (i, 0)),
        pl.BlockSpec((tb, L), lambda i: (i, 0)),
    ]
    weights = (we1, be1, w_agg, b_agg, wl1_loc, bl1, wl2, bl2)
    # Weights use constant index maps -> stay VMEM-resident across all grid steps.
    w_specs = [pl.BlockSpec(w.shape, lambda i, _n=w.ndim: (0,) * _n) for w in weights]

    return pl.pallas_call(
        _fused_kernel,
        out_shape=jax.ShapeDtypeStruct((B, latent_dim), jnp.float32),
        grid=(n_tiles,),
        in_specs=act_specs + w_specs,
        out_specs=pl.BlockSpec((tb, latent_dim), lambda i: (i, 0)),
        compiler_params=pltpu.CompilerParams(
            dimension_semantics=("parallel",)),
    )(agg_obs, visible_count, local_obs, *weights)


def _linear_init(key, fan_in, fan_out):
    # deterministic, PyTorch-nn.Linear-style uniform(-1/sqrt(fan_in), 1/sqrt(fan_in))
    kw, kb = jax.random.split(key)
    bound = 1.0 / (fan_in ** 0.5)
    w = jax.random.uniform(kw, (fan_in, fan_out), jnp.float32, -bound, bound)
    b = jax.random.uniform(kb, (1, fan_out), jnp.float32, -bound, bound)
    return w, b


def _reference(agg_obs, visible_count, local_obs, params):
    # Straight transcription of the PyTorch forward (un-fused form).
    we1, be1, we2, be2, wl1_loc, wl1_agg, bl1, wl2, bl2 = params
    h = jnp.tanh(jnp.einsum('bnf,fh->bnh', agg_obs, we1) + be1)
    e = jnp.einsum('bnh,hd->bnd', h, we2) + be2
    agg = jnp.sum(e, axis=1) / visible_count
    cat = jnp.concatenate([local_obs, agg], axis=-1)
    w_l1 = jnp.concatenate([wl1_loc, wl1_agg], axis=0)
    hl = jnp.tanh(cat @ w_l1 + bl1)
    return hl @ wl2 + bl2


if __name__ == "__main__":
    # Small shapes consistent with the module's forward:
    B, N = 2, 8                 # batch, neighbors
    F_in = 16                   # per-neighbor observation feature dim
    H_e = 32                    # Embed() hidden width
    D = 32                      # latent_embedding_dim (= embedder_out_dim for Mean mode)
    L = 16                      # local_obs_dim
    H_l = 32                    # latent_out_hidden_layer_sizes = [32]
    latent_dim = 16             # config.latent_dim

    root = jax.random.PRNGKey(0)
    k_obs, k_loc, k_e1, k_e2, k_l1a, k_l1b, k_l2 = jax.random.split(root, 7)

    agg_obs = jax.random.normal(k_obs, (B, N, F_in), jnp.float32)
    local_obs = jax.random.normal(k_loc, (B, L), jnp.float32)
    visible_count = jnp.full((B, 1), float(N), jnp.float32)

    we1, be1 = _linear_init(k_e1, F_in, H_e)
    we2, be2 = _linear_init(k_e2, H_e, D)
    # later_layer first linear has fan_in = L + D; split its weight across the concat.
    wl1_full, bl1 = _linear_init(k_l1a, L + D, H_l)
    wl1_loc, wl1_agg = wl1_full[:L], wl1_full[L:]
    wl2, bl2 = _linear_init(k_l2, H_l, latent_dim)

    params = (we1, be1, we2, be2, wl1_loc, wl1_agg, bl1, wl2, bl2)

    out = full_aggregating_embedder(agg_obs, visible_count, local_obs, params)
    out = jax.block_until_ready(out)

    ref = _reference(agg_obs, visible_count, local_obs, params)
    assert out.shape == (B, latent_dim)
    # tolerance allows for the approximate (EUP) reciprocal and f32 reassociation
    assert jnp.allclose(out, ref, atol=2e-3, rtol=2e-3), (out, ref)
    print("KERNEL_OK")
</pallas_src>

<mosaic_0001>
module attributes {stable_mosaic.version = 11 : i64} {
  func.func @_fused_kernel(%arg0: i32, %arg1: memref<2x8x16xf32, #tpu.memory_space<vmem>>, %arg2: memref<2x1xf32, #tpu.memory_space<vmem>>, %arg3: memref<2x16xf32, #tpu.memory_space<vmem>>, %arg4: memref<16x32xf32, #tpu.memory_space<vmem>>, %arg5: memref<1x32xf32, #tpu.memory_space<vmem>>, %arg6: memref<32x32xf32, #tpu.memory_space<vmem>>, %arg7: memref<1x32xf32, #tpu.memory_space<vmem>>, %arg8: memref<16x32xf32, #tpu.memory_space<vmem>>, %arg9: memref<1x32xf32, #tpu.memory_space<vmem>>, %arg10: memref<32x16xf32, #tpu.memory_space<vmem>>, %arg11: memref<1x16xf32, #tpu.memory_space<vmem>>, %arg12: memref<2x16xf32, #tpu.memory_space<vmem>>) attributes {dimension_semantics = [#tpu.dimension_semantics<parallel>], iteration_bounds = array<i64: 1>, scalar_prefetch = 0 : i64, scratch_operands = 0 : i64, tpu.core_type = #tpu.core_type<tc>, window_params = [{transform_indices = @transform_0, window_bounds = array<i64: 2, 8, 16>}, {transform_indices = @transform_1, window_bounds = array<i64: 2, 1>}, {transform_indices = @transform_2, window_bounds = array<i64: 2, 16>}, {pipeline_mode = #tpu.pipeline_mode<synchronous>, transform_indices = @transform_3, window_bounds = array<i64: 16, 32>}, {pipeline_mode = #tpu.pipeline_mode<synchronous>, transform_indices = @transform_4, window_bounds = array<i64: 1, 32>}, {pipeline_mode = #tpu.pipeline_mode<synchronous>, transform_indices = @transform_5, window_bounds = array<i64: 32, 32>}, {pipeline_mode = #tpu.pipeline_mode<synchronous>, transform_indices = @transform_6, window_bounds = array<i64: 1, 32>}, {pipeline_mode = #tpu.pipeline_mode<synchronous>, transform_indices = @transform_7, window_bounds = array<i64: 16, 32>}, {pipeline_mode = #tpu.pipeline_mode<synchronous>, transform_indices = @transform_8, window_bounds = array<i64: 1, 32>}, {pipeline_mode = #tpu.pipeline_mode<synchronous>, transform_indices = @transform_9, window_bounds = array<i64: 32, 16>}, {pipeline_mode = #tpu.pipeline_mode<synchronous>, transform_indices = @transform_10, window_bounds = array<i64: 1, 16>}, {transform_indices = @transform_11, window_bounds = array<i64: 2, 16>}]} {
    %c0 = arith.constant 0 : index
    %c0_0 = arith.constant 0 : index
    %c0_1 = arith.constant 0 : index
    %0 = vector.load %arg1[%c0, %c0_0, %c0_1] : memref<2x8x16xf32, #tpu.memory_space<vmem>>, vector<2x8x16xf32>
    %1 = vector.shape_cast %0 : vector<2x8x16xf32> to vector<16x16xf32>
    %c0_2 = arith.constant 0 : index
    %c0_3 = arith.constant 0 : index
    %2 = vector.load %arg4[%c0_2, %c0_3] : memref<16x32xf32, #tpu.memory_space<vmem>>, vector<16x32xf32>
    %cst = arith.constant dense<0.000000e+00> : vector<16x32xf32>
    %3 = tpu.matmul %1, %2, %cst {dimension_numbers = #tpu.dot_dimension_numbers<[1], [0], [0], [1], [0, 0, 1, 1], [], []>} : vector<16x16xf32>, vector<16x32xf32>, vector<16x32xf32> -> vector<16x32xf32>
    %c0_4 = arith.constant 0 : index
    %c0_5 = arith.constant 0 : index
    %4 = vector.load %arg5[%c0_4, %c0_5] : memref<1x32xf32, #tpu.memory_space<vmem>>, vector<1x32xf32>
    %5 = vector.broadcast %4 : vector<1x32xf32> to vector<16x32xf32>
    %6 = arith.addf %3, %5 : vector<16x32xf32>
    %7 = math.tanh %6 : vector<16x32xf32>
    %8 = vector.shape_cast %7 : vector<16x32xf32> to vector<2x8x32xf32>
    %cst_6 = arith.constant dense<0.000000e+00> : vector<2x32xf32>
    %9 = vector.multi_reduction <add>, %8, %cst_6 [1] : vector<2x8x32xf32> to vector<2x32xf32>
    %c0_7 = arith.constant 0 : index
    %c0_8 = arith.constant 0 : index
    %10 = vector.load %arg2[%c0_7, %c0_8] : memref<2x1xf32, #tpu.memory_space<vmem>>, vector<2x1xf32>
    %11 = tpu.reciprocal %10 {approx = true} : vector<2x1xf32> -> vector<2x1xf32>
    %c0_9 = arith.constant 0 : index
    %c0_10 = arith.constant 0 : index
    %12 = vector.load %arg6[%c0_9, %c0_10] : memref<32x32xf32, #tpu.memory_space<vmem>>, vector<32x32xf32>
    %cst_11 = arith.constant dense<0.000000e+00> : vector<2x32xf32>
    %13 = tpu.matmul %9, %12, %cst_11 {dimension_numbers = #tpu.dot_dimension_numbers<[1], [0], [0], [1], [0, 0, 1, 1], [], []>} : vector<2x32xf32>, vector<32x32xf32>, vector<2x32xf32> -> vector<2x32xf32>
    %c0_12 = arith.constant 0 : index
    %c0_13 = arith.constant 0 : index
    %14 = vector.load %arg7[%c0_12, %c0_13] : memref<1x32xf32, #tpu.memory_space<vmem>>, vector<1x32xf32>
    %15 = vector.broadcast %14 : vector<1x32xf32> to vector<2x32xf32>
    %16 = arith.addf %13, %15 : vector<2x32xf32>
    %17 = vector.broadcast %11 : vector<2x1xf32> to vector<2x32xf32>
    %18 = arith.mulf %16, %17 : vector<2x32xf32>
    %c0_14 = arith.constant 0 : index
    %c0_15 = arith.constant 0 : index
    %19 = vector.load %arg3[%c0_14, %c0_15] : memref<2x16xf32, #tpu.memory_space<vmem>>, vector<2x16xf32>
    %c0_16 = arith.constant 0 : index
    %c0_17 = arith.constant 0 : index
    %20 = vector.load %arg8[%c0_16, %c0_17] : memref<16x32xf32, #tpu.memory_space<vmem>>, vector<16x32xf32>
    %cst_18 = arith.constant dense<0.000000e+00> : vector<2x32xf32>
    %21 = tpu.matmul %19, %20, %cst_18 {dimension_numbers = #tpu.dot_dimension_numbers<[1], [0], [0], [1], [0, 0, 1, 1], [], []>} : vector<2x16xf32>, vector<16x32xf32>, vector<2x32xf32> -> vector<2x32xf32>
    %22 = arith.addf %21, %18 : vector<2x32xf32>
    %c0_19 = arith.constant 0 : index
    %c0_20 = arith.constant 0 : index
    %23 = vector.load %arg9[%c0_19, %c0_20] : memref<1x32xf32, #tpu.memory_space<vmem>>, vector<1x32xf32>
    %24 = vector.broadcast %23 : vector<1x32xf32> to vector<2x32xf32>
    %25 = arith.addf %22, %24 : vector<2x32xf32>
    %26 = math.tanh %25 : vector<2x32xf32>
    %c0_21 = arith.constant 0 : index
    %c0_22 = arith.constant 0 : index
    %27 = vector.load %arg10[%c0_21, %c0_22] : memref<32x16xf32, #tpu.memory_space<vmem>>, vector<32x16xf32>
    %cst_23 = arith.constant dense<0.000000e+00> : vector<2x16xf32>
    %28 = tpu.matmul %26, %27, %cst_23 {dimension_numbers = #tpu.dot_dimension_numbers<[1], [0], [0], [1], [0, 0, 1, 1], [], []>} : vector<2x32xf32>, vector<32x16xf32>, vector<2x16xf32> -> vector<2x16xf32>
    %c0_24 = arith.constant 0 : index
    %c0_25 = arith.constant 0 : index
    %29 = vector.load %arg11[%c0_24, %c0_25] : memref<1x16xf32, #tpu.memory_space<vmem>>, vector<1x16xf32>
    %30 = vector.broadcast %29 : vector<1x16xf32> to vector<2x16xf32>
    %31 = arith.addf %28, %30 : vector<2x16xf32>
    %c0_26 = arith.constant 0 : index
    %c0_27 = arith.constant 0 : index
    %32 = vector.load %arg12[%c0_26, %c0_27] : memref<2x16xf32, #tpu.memory_space<vmem>>, vector<2x16xf32>
    tpu.vector_store %arg12[%c0_26, %c0_27], %31 {strides = array<i32>} : memref<2x16xf32, #tpu.memory_space<vmem>>, vector<2x16xf32>,
    return
  }
  func.func @transform_0(%arg0: i32) -> (i32, i32, i32) {
    %c0_i32 = arith.constant 0 : i32
    %c0_i32_0 = arith.constant 0 : i32
    %c0_i32_1 = arith.constant 0 : i32
    return %arg0, %c0_i32, %c0_i32_0 : i32, i32, i32
  }
  func.func @transform_1(%arg0: i32) -> (i32, i32) {
    %c0_i32 = arith.constant 0 : i32
    %c0_i32_0 = arith.constant 0 : i32
    return %arg0, %c0_i32 : i32, i32
  }
  func.func @transform_2(%arg0: i32) -> (i32, i32) {
    %c0_i32 = arith.constant 0 : i32
    %c0_i32_0 = arith.constant 0 : i32
    return %arg0, %c0_i32 : i32, i32
  }
  func.func @transform_3(%arg0: i32) -> (i32, i32) {
    %c0_i32 = arith.constant 0 : i32
    %c0_i32_0 = arith.constant 0 : i32
    %c0_i32_1 = arith.constant 0 : i32
    return %c0_i32, %c0_i32_0 : i32, i32
  }
  func.func @transform_4(%arg0: i32) -> (i32, i32) {
    %c0_i32 = arith.constant 0 : i32
    %c0_i32_0 = arith.constant 0 : i32
    %c0_i32_1 = arith.constant 0 : i32
    return %c0_i32, %c0_i32_0 : i32, i32
  }
  func.func @transform_5(%arg0: i32) -> (i32, i32) {
    %c0_i32 = arith.constant 0 : i32
    %c0_i32_0 = arith.constant 0 : i32
    %c0_i32_1 = arith.constant 0 : i32
    return %c0_i32, %c0_i32_0 : i32, i32
  }
  func.func @transform_6(%arg0: i32) -> (i32, i32) {
    %c0_i32 = arith.constant 0 : i32
    %c0_i32_0 = arith.constant 0 : i32
    %c0_i32_1 = arith.constant 0 : i32
    return %c0_i32, %c0_i32_0 : i32, i32
  }
  func.func @transform_7(%arg0: i32) -> (i32, i32) {
    %c0_i32 = arith.constant 0 : i32
    %c0_i32_0 = arith.constant 0 : i32
    %c0_i32_1 = arith.constant 0 : i32
    return %c0_i32, %c0_i32_0 : i32, i32
  }
  func.func @transform_8(%arg0: i32) -> (i32, i32) {
    %c0_i32 = arith.constant 0 : i32
    %c0_i32_0 = arith.constant 0 : i32
    %c0_i32_1 = arith.constant 0 : i32
    return %c0_i32, %c0_i32_0 : i32, i32
  }
  func.func @transform_9(%arg0: i32) -> (i32, i32) {
    %c0_i32 = arith.constant 0 : i32
    %c0_i32_0 = arith.constant 0 : i32
    %c0_i32_1 = arith.constant 0 : i32
    return %c0_i32, %c0_i32_0 : i32, i32
  }
  func.func @transform_10(%arg0: i32) -> (i32, i32) {
    %c0_i32 = arith.constant 0 : i32
    %c0_i32_0 = arith.constant 0 : i32
    %c0_i32_1 = arith.constant 0 : i32
    return %c0_i32, %c0_i32_0 : i32, i32
  }
  func.func @transform_11(%arg0: i32) -> (i32, i32) {
    %c0_i32 = arith.constant 0 : i32
    %c0_i32_0 = arith.constant 0 : i32
    return %arg0, %c0_i32 : i32, i32
  }
}

</mosaic_0001>

<bundles_post_ra>
// kernel: tpu_custom_call.1
= control target key start
LH: loop header
LB: loop body
LE: loop exit
PB: predicated region body
PF: predicated region fallthrough
CT: control target
= control target key end

     0   :  { %16 = vsyncpa [#allocation3], 0  ;;  %s480_s0 = inlined_call_operand.vmem [shape: f32[2,8,16], index: 0, kind: input, shape index: {}]   ;;  %s481_s1 = inlined_call_operand.vmem [shape: f32[2,1], index: 1, kind: input, shape index: {}]   ;;  %s482_s2 = inlined_call_operand.vmem [shape: f32[2,16], index: 2, kind: input, shape index: {}]   ;;  %s483_s3 = inlined_call_operand.hbm [shape: f32[16,32], index: 3, kind: input, shape index: {}]   ;;  %s484_s4 = inlined_call_operand.vmem [shape: f32[1,32], index: 4, kind: input, shape index: {}]   ;;  %s485_s5 = inlined_call_operand.vmem [shape: f32[32,32], index: 5, kind: input, shape index: {}]   ;;  %s486_s6 = inlined_call_operand.vmem [shape: f32[1,32], index: 6, kind: input, shape index: {}]   ;;  %s487_s7 = inlined_call_operand.hbm [shape: f32[16,32], index: 7, kind: input, shape index: {}]   ;;  %s488_s8 = inlined_call_operand.vmem [shape: f32[1,32], index: 8, kind: input, shape index: {}]   ;;  %s489_s9 = inlined_call_operand.vmem [shape: f32[32,16], index: 9, kind: input, shape index: {}]   ;;  %s490_s10 = inlined_call_operand.vmem [shape: f32[1,16], index: 10, kind: input, shape index: {}]   ;;  %s491_s11 = inlined_call_operand.hbm [shape: f32[2,16], index: 11, kind: output, shape index: {}]  }
   0x1   :  { %17 = vsyncpa [#allocation6], 0 }
   0x2   :  { %18 = vsyncpa [#allocation4], 0  ;;  %s29_s19 = sshll.u32 %s483_s3, 4  ;;  %s353_s20 = smov [#allocation2]   ;;  %s30_s19 = int_to_ptr.hbm [resolvable:$true] %s29_s19 }
   0x3   :  { %s31_s21 = sshll.u32 %s353_s20, 4  ;;  %s48_s24 = sshll.u32 %s487_s7, 4  ;;  %s32_s21 = int_to_ptr.vmem [resolvable:$true] %s31_s21  ;;  %s49_s24 = int_to_ptr.hbm [resolvable:$true] %s48_s24 }
   0x4   :  { %s354_s25 = smov 128   ;;  %s355_s26 = smov 8  }
   0x5   :  { %37 = dma.hbm_to_vmem [thread:$0]  %s30_s19, 256, %s32_s21, [#allocation3], %s354_s25, %s354_s25, %s355_s26  }
   0x6   :  { %s356_s27 = smov [#allocation5]  }
   0x7   :  { %s50_s28 = sshll.u32 %s356_s27, 4  ;;  %s51_s28 = int_to_ptr.vmem [resolvable:$true] %s50_s28 }
   0x8   :  { %56 = dma.hbm_to_vmem [thread:$0]  %s49_s24, 256, %s51_s28, [#allocation6], %s354_s25, %s354_s25, %s355_s26  }
   0x9   :  { %347 = dma.done.wait [#allocation3], 256  }
   0xa   :  { %348 = vsyncadd [#allocation3], 4294967040 }
   0xb   :  { %349 = dma.done.wait [#allocation6], 256  }
   0xc   :  { %350 = vsyncadd [#allocation6], 4294967040  ;;  %v74_v0 = vld [vmem:[#allocation2 + $0x8] sm:$0xff]  ;;  %v73_v1 = vld [vmem:[#allocation2] sm:$0xff]  ;;  %vm79_vm0 = vcmask 130048   ;;  %v357_v15 = vmov 0  }
   0xd   :  { %100 = vmatpush.msra.mxu0 %v74_v0  ;;  %v71_v2 = vld [vmem:[%s480_s0] sm:$0xff]  ;;  %v72_v3 = vld [vmem:[%s480_s0 + $0x8] sm:$0xff]  ;;  %v131_v4 = vld [vmem:[%s485_s5 + $0x18] sm:$0xff]  ;;  %262 = vset.pattern.permute.xlu0 %v357_v15  ;;  %vm111_vm1 = vcmask 261120   ;;  %vm138_vm2 = vcmask 1041409   ;;  %s240_s16 = sshll.u32 %s491_s11, 4  ;;  %s241_s16 = int_to_ptr.hbm [resolvable:$true] %s240_s16 }
   0xe   :  { %v130_v5 = vld [vmem:[%s485_s5 + $0x10] sm:$0xff]  ;;  %v170_v6 = vld [vmem:[#allocation5 + $0x8] sm:$0xff]  ;;  %154 = vmatpush.msra.mxu1 %v131_v4  ;;  %v168_v8 = vld [vmem:[%s482_s2] sm:$0x3]  ;;  %vm231_vm3 = vcmask 123904  }
   0xf   :  { %101 = vmatpush.msra.mxu0 %v73_v1  ;;  %188 = vmatpush.msra.mxu2 %v170_v6  ;;  %v169_v7 = vld [vmem:[#allocation5] sm:$0xff]  ;;  %v129_v9 = vld [vmem:[%s485_s5 + $0x8] sm:$0xff]  ;;  %v128_v10 = vld [vmem:[%s485_s5] sm:$0xff] }
  0x10   :  { %251 = vmatmul.msk.f32.vlgmr.msra.gmra.mxu0 %vm79_vm0, %v71_v2  ;;  %155 = vmatpush.msra.mxu1 %v130_v5  ;;  %v263_v11 = vld [vmem:[%s484_s4] ss:$0 sm:$0xff]  ;;  %v203_v36 = vld [vmem:[%s489_s9 + $0x18] sm:$0xff]  ;;  %v202_v37 = vld [vmem:[%s489_s9 + $0x10] sm:$0xff] }
  0x11   :  { %189 = vmatpush.msra.mxu2 %v169_v7  ;;  %v126_v13 = vld [vmem:[%s481_s1] sm:$0x3]  ;;  %223 = vmatpush.msra.mxu3 %v203_v36  ;;  %v201_v38 = vld [vmem:[%s489_s9 + $0x8] sm:$0xff] }
  0x12   :  { %254 = vmatmul.msk.f32.vlgmr.msra.gmra.mxu2 %vm79_vm0, %v168_v8  ;;  %156 = vmatpush.msra.mxu1 %v129_v9  ;;  %267 = vrcp.f32 %v126_v13  ;;  %v200_v39 = vld [vmem:[%s489_s9] sm:$0xff] }
  0x13   :  { %224 = vmatpush.msra.mxu3 %v202_v37  ;;  %v264_v40 = vld [vmem:[%s486_s6] ss:$0 sm:$0xff]  ;;  %s358_s6 = smov [#allocation7]  }
  0x14   :  { %157 = vmatpush.msra.mxu1 %v128_v10  ;;  %v265_v46 = vld [vmem:[%s488_s8] ss:$0 sm:$0xff]  ;;  %s238_s13 = sshll.u32 %s358_s6, 4  ;;  %s239_s13 = int_to_ptr.vmem [resolvable:$true] %s238_s13 }
  0x15   :  { %225 = vmatpush.msra.mxu3 %v201_v38  ;;  %v266_v50 = vld [vmem:[%s490_s10] ss:$0 sm:$0xff] }
  0x17   :  { %226 = vmatpush.msra.mxu3 %v200_v39 }
  0x18   :  { %252 = vmatmul.msk.f32.gmra.mxu0 %vm79_vm0, %v72_v3  ;;  %v268_v16 = vpop.eup %267 }
  0x19   :  { %164 = vperm.xlu0 %262, %v268_v16  }
  0x8b   :  { %v165_v42 = vpop.permute.xlu0 %164 }
  0x8d   :  { %v103_v12 = vpop.f32.mrf.mxu0 }
  0x8e   :  { %v104_v14 = vadd.f32 %v263_v11, %v103_v12 }
  0x90   :  { %269 = vtanh.f32 %v104_v14 }
  0x95   :  { %v106_v17 = vpop.f32.mrf.mxu0  ;;  %v191_v44 = vpop.f32.mrf.mxu2 }
  0x96   :  { %v270_v18 = vpop.eup %269  ;;  %v107_v19 = vadd.f32 %v263_v11, %v106_v17 }
  0x97   :  { %v112_v20 = vsel %vm111_vm1, %v270_v18, 0.0 }
  0x98   :  { %271 = vtanh.f32 %v107_v19  ;;  %v113_v21 = vrot.slane %v112_v20, 4 }
  0x9a   :  { %v114_v22 = vadd.f32 %v113_v21, %v112_v20 }
  0x9c   :  { %v115_v24 = vrot.slane %v114_v22, 2 }
  0x9e   :  { %v272_v23 = vpop.eup %271  ;;  %v116_v27 = vadd.f32 %v115_v24, %v114_v22 }
  0x9f   :  { %v119_v25 = vsel %vm111_vm1, %v272_v23, 0.0 }
  0xa0   :  { %v120_v26 = vrot.slane %v119_v25, 4  ;;  %v117_v30 = vrot.slane %v116_v27, 1 }
  0xa2   :  { %v121_v28 = vadd.f32 %v120_v26, %v119_v25  ;;  %v118_v33 = vadd.f32 %v117_v30, %v116_v27 }
  0xa4   :  { %v122_v29 = vrot.slane %v121_v28, 2 }
  0xa6   :  { %v123_v31 = vadd.f32 %v122_v29, %v121_v28 }
  0xa8   :  { %v124_v32 = vrot.slane %v123_v31, 1 }
  0xaa   :  { %v125_v34 = vadd.f32 %v124_v32, %v123_v31 }
  0xac   :  { %v139_v35 = vsel %vm138_vm2, %v125_v34, %v118_v33 }
  0xad   :  { %253 = vmatmul.msk.f32.vlgmr.msra.gmra.mxu1 %vm111_vm1, %v139_v35 }
 0x12a   :  { %v159_v41 = vpop.f32.mrf.mxu1 }
 0x12b   :  { %v160_v43 = vadd.f32 %v264_v40, %v159_v41 }
 0x12d   :  { %v167_v45 = vmul.f32 %v165_v42, %v160_v43 }
 0x12f   :  { %v192_v47 = vadd.f32 %v191_v44, %v167_v45 }
 0x131   :  { %v198_v48 = vadd.f32 %v265_v46, %v192_v47 }
 0x133   :  { %273 = vtanh.f32 %v198_v48 }
 0x139   :  { %v274_v49 = vpop.eup %273 }
 0x13a   :  { %255 = vmatmul.msk.f32.vlgmr.msra.gmra.mxu3 %vm111_vm1, %v274_v49 }
 0x1bd   :  { %v228_v51 = vpop.f32.mrf.mxu3 }
 0x1be   :  { %v229_v52 = vadd.f32 %v266_v50, %v228_v51 }
 0x1c0   :  { %232 = vst.msk [vmem:[#allocation7] sm:$0x3] %vm231_vm3, %v229_v52 }
 0x1c1   :  { %243 = dma.vmem_to_hbm [thread:$0]  %s239_s13, 32, %s241_s16, [#allocation4]  }
 0x1c2   :  { %351 = dma.done.wait [#allocation4], 32  }
 0x1c3   :  { %352 = vsyncadd [#allocation4], 4294967264 }
 0x1c4   :  { %248 = vsyncpa [#allocation3], 1 }
 0x1c5   :  { %249 = vsyncpa [#allocation6], 1 }
 0x1c6   :  { %250 = vsyncpa [#allocation4], 1 }

</bundles_post_ra>
